<compile_context>
chip_gen: v7x
topology: tpu7x:2x2x1
jax: 0.10.0
libtpu: 0.0.40
codegen_flags: <defaults>
</compile_context>

<pallas_src>
import functools
import math

import jax
import jax.numpy as jnp
from jax.experimental import pallas as pl
from jax.experimental.pallas import tpu as pltpu


# ---------------------------------------------------------------------------
# helpers
# ---------------------------------------------------------------------------
def _round_up(a, b):
    return ((a + b - 1) // b) * b


def _cdiv(a, b):
    return (a + b - 1) // b


def _vmem_capacity_bytes():
    """Per-core VMEM capacity; conservative (v7x, 64 MiB) fallback."""
    try:
        info = pltpu.get_tpu_info()
        cap = getattr(info, "vmem_capacity_bytes", None)
        if cap:
            return int(cap)
    except Exception:
        pass
    return 64 * 1024 * 1024


def _tn_cap():
    # 128-MiB-VMEM parts (v5e/v6e) can afford 512-wide inter chunks;
    # v7x (64 MiB / TensorCore) stays at <= 256.
    return 512 if _vmem_capacity_bytes() >= 100 * 1024 * 1024 else 256


def _pick_tn(inter, requested=None, cap=None):
    """Inter_dim chunk that divides `inter`, is lane-friendly, fits VMEM."""
    cap = _tn_cap() if cap is None else cap
    if requested is not None and inter % requested == 0:
        return requested
    if inter <= cap:
        return inter
    for c in range(cap, 127, -128):
        if inter % c == 0:
            return c
    return inter  # fall back to un-chunked (still correct)


# ---------------------------------------------------------------------------
# Grouped gated-MLP kernel (shared by routed experts and the shared expert)
# ---------------------------------------------------------------------------
def _grouped_mlp_kernel(be_ref, bsrc_ref,                     # scalar prefetch (SMEM)
                        x_ref, w13_ref, w2_ref, scale_ref,    # inputs
                        o_ref,                                 # output
                        acc_ref,                               # VMEM scratch
                        *, tn):
    i = pl.program_id(0)
    n = pl.program_id(1)
    n_last = pl.num_programs(1) - 1
    valid = bsrc_ref[i] == i            # padding blocks carry bsrc[i] != i

    @pl.when(jnp.logical_and(valid, n == 0))
    def _init():
        acc_ref[...] = jnp.zeros_like(acc_ref)

    @pl.when(valid)
    def _compute():
        x = x_ref[...]                                                    # (tm, dim)
        # fused W1|W3 chunk: one (tm,dim)x(dim,2*tn) matmul, then split
        h13 = jnp.dot(x, w13_ref[...], preferred_element_type=jnp.float32)
        h1 = h13[:, :tn]
        h3 = h13[:, tn:]
        gated = (h1 * jax.nn.sigmoid(h1)) * h3                            # SiLU gate
        acc_ref[...] += jnp.dot(gated.astype(w2_ref.dtype), w2_ref[...],
                                preferred_element_type=jnp.float32)       # (tm, dim)

    @pl.when(jnp.logical_and(valid, n == n_last))
    def _store():
        # routing weight folded into the epilogue (f32), then cast once
        o_ref[...] = (acc_ref[...] *
                      scale_ref[...].astype(jnp.float32)).astype(o_ref.dtype)


def _grouped_mlp(x_rows, block_expert, block_src, scale, w13s, w2s, *,
                 tm, tn, out_dtype=None):
    """x_rows: (rows, dim), rows % tm == 0; block i's rows come from row block
    block_src[i] and use expert block_expert[i]'s weights; blocks with
    block_src[i] != i are padding and are skipped (no compute, no fresh DMA).
    w13s: (E, dim, 2*inter) chunk-interleaved [w1|w3]; w2s: (E, inter, dim)."""
    rows, dim = x_rows.shape
    n_experts, dim_w, two_inter = w13s.shape
    inter = two_inter // 2
    assert dim_w == dim and w2s.shape == (n_experts, inter, dim)
    assert rows % tm == 0, "rows must be padded to a multiple of tm"
    assert inter % tn == 0, "tn must divide inter_dim"

    num_blocks = rows // tm
    num_chunks = inter // tn
    last_chunk = num_chunks - 1
    out_dtype = out_dtype or x_rows.dtype

    x_bytes = jnp.dtype(x_rows.dtype).itemsize
    w_bytes = jnp.dtype(w13s.dtype).itemsize
    o_bytes = jnp.dtype(out_dtype).itemsize

    # VMEM budget: double-buffered tiles + f32 accumulator + headroom,
    # clamped generation-aware (~85% of physical VMEM: v5e/v6e ~108 MiB,
    # v7x ~54 MiB per TensorCore).
    tile_bytes = (tm * dim * x_bytes            # x tile
                  + dim * 2 * tn * w_bytes      # fused W1|W3 chunk
                  + tn * dim * w_bytes          # W2 chunk
                  + tm * 4                      # scale tile
                  + tm * dim * o_bytes)         # out tile
    need = 2 * tile_bytes + tm * dim * 4 + (4 << 20)
    vmem_cap = int(_vmem_capacity_bytes() * 0.85)
    vmem_limit = int(min(max(need, 32 * 1024 * 1024), vmem_cap))

    cost = pl.CostEstimate(
        flops=6 * rows * dim * inter,                       # 3 fused matmuls
        transcendentals=rows * inter,                       # sigmoid
        bytes_accessed=(2 * rows * dim * x_bytes
                        + rows * dim * o_bytes
                        + num_blocks * 3 * dim * inter * w_bytes),
    )

    def _n_eff(i, n, bs):
        # padding blocks keep pointing at the previous (last real) weight
        # chunk so no new weight DMA is issued for dead work
        return jnp.where(bs[i] == i, n, last_chunk)

    grid_spec = pltpu.PrefetchScalarGridSpec(
        num_scalar_prefetch=2,
        grid=(num_blocks, num_chunks),
        in_specs=[
            pl.BlockSpec((tm, dim), lambda i, n, be, bs: (bs[i], 0)),       # x rows
            pl.BlockSpec((None, dim, 2 * tn),                               # W1|W3 chunk
                         lambda i, n, be, bs: (be[i], 0, _n_eff(i, n, bs))),
            pl.BlockSpec((None, tn, dim),                                   # W2 chunk
                         lambda i, n, be, bs: (be[i], _n_eff(i, n, bs), 0)),
            pl.BlockSpec((tm, 1), lambda i, n, be, bs: (bs[i], 0)),         # routing scale
        ],
        out_specs=pl.BlockSpec((tm, dim), lambda i, n, be, bs: (i, 0)),
        scratch_shapes=[pltpu.VMEM((tm, dim), jnp.float32)],                # f32 accumulator
    )

    return pl.pallas_call(
        functools.partial(_grouped_mlp_kernel, tn=tn),
        out_shape=jax.ShapeDtypeStruct((rows, dim), out_dtype),
        grid_spec=grid_spec,
        compiler_params=pltpu.CompilerParams(
            dimension_semantics=("parallel", "arbitrary"),
            vmem_limit_bytes=vmem_limit,
        ),
        cost_estimate=cost,
    )(block_expert, block_src, x_rows, w13s, w2s, scale)


# ---------------------------------------------------------------------------
# Gate / routing glue (small scalar & integer work, done in plain JAX)
# ---------------------------------------------------------------------------
def _gate_scores(x2, gate_w):
    scores = jnp.einsum('md,ed->me', x2, gate_w)
    return jax.nn.softmax(scores.astype(jnp.float32), axis=-1)


# ---------------------------------------------------------------------------
# Full MoE forward
# ---------------------------------------------------------------------------
def moe_forward(x, params, cfg, *, tm_routed=None, tm_shared=None):
    dim = cfg['dim']
    n_exp = cfg['n_routed_experts']
    topk = cfg['n_activated_experts']
    route_scale = cfg.get('route_scale', 1.0)

    orig_shape = x.shape
    x2 = x.reshape(-1, dim)
    M = x2.shape[0]
    A = M * topk

    tn_r = int(params['tn_r'])
    tn_s = int(params['tn_s'])

    if tm_routed is None:
        # review: need tm ~256+ to beat the weight-BW roofline; cap for tiny M
        tm_routed = min(256, max(8, _round_up(A, 8)))
    if tm_shared is None:
        # default 512, but keep >=2 blocks so both v7x TensorCores get work
        tm_shared = min(512, max(8, _round_up(max(M // 2, 1), 8)))

    # ------------------------------ Gate ------------------------------------
    # TODO(synk): group-limited routing (n_expert_groups>1), sigmoid scoring
    # renorm and the dim==7168 gate bias are not implemented (unused by the
    # default ModelArgs path: softmax, 1 group, no bias).
    scores = _gate_scores(x2, params['gate_w'])
    weights, indices = jax.lax.top_k(scores, topk)            # (M, k)
    weights = (weights * route_scale).astype(jnp.float32)

    # ------------- Dispatch: sort (token, expert) pairs by expert -----------
    flat_e = indices.reshape(-1).astype(jnp.int32)
    flat_t = jnp.repeat(jnp.arange(M, dtype=jnp.int32), topk)
    flat_w = weights.reshape(-1)

    order = jnp.argsort(flat_e)
    se, st, sw = flat_e[order], flat_t[order], flat_w[order]

    counts = jnp.bincount(flat_e, length=n_exp)
    padded_counts = ((counts + tm_routed - 1) // tm_routed) * tm_routed
    csum_p = jnp.cumsum(padded_counts)
    csum_u = jnp.cumsum(counts)
    grp_start_p = (csum_p - padded_counts).astype(jnp.int32)
    grp_start_u = (csum_u - counts).astype(jnp.int32)
    dest = grp_start_p[se] + (jnp.arange(A, dtype=jnp.int32) - grp_start_u[se])

    rows = (_cdiv(A, tm_routed) + n_exp) * tm_routed          # static worst case
    num_blocks = rows // tm_routed

    x_disp = jnp.zeros((rows, dim), x2.dtype).at[dest].set(x2[st])
    # routing weight scattered into dispatch order (applied inside the kernel)
    scale_disp = jnp.zeros((rows, 1), jnp.float32).at[dest, 0].set(sw)

    blk_ids = jnp.arange(num_blocks, dtype=jnp.int32)
    num_real_blocks = (csum_p[-1] // tm_routed).astype(jnp.int32)
    last_real = jnp.maximum(num_real_blocks - 1, 0)
    be_raw = jnp.minimum(
        jnp.searchsorted(csum_p, blk_ids * tm_routed, side='right'),
        n_exp - 1).astype(jnp.int32)
    blk_valid = blk_ids < num_real_blocks
    # padding blocks alias the last real block (expert + source rows): the
    # kernel skips their compute and Pallas issues no fresh DMAs for them.
    block_expert = jnp.where(blk_valid, be_raw, be_raw[last_real]).astype(jnp.int32)
    block_src = jnp.where(blk_valid, blk_ids, last_real).astype(jnp.int32)

    # --------------------------- Routed experts -----------------------------
    y_disp = _grouped_mlp(x_disp, block_expert, block_src, scale_disp,
                          params['w13s'], params['w2s'],
                          tm=tm_routed, tn=tn_r, out_dtype=x2.dtype)
    # top-k combine in f32 for accuracy
    y = jnp.zeros((M, dim), jnp.float32).at[st].add(
        y_disp[dest].astype(jnp.float32))

    # --------------------------- Shared experts -----------------------------
    M_pad = _round_up(M, tm_shared)
    nblk_s = M_pad // tm_shared
    x_pad = jnp.pad(x2, ((0, M_pad - M), (0, 0)))
    z = _grouped_mlp(x_pad,
                     jnp.zeros((nblk_s,), jnp.int32),
                     jnp.arange(nblk_s, dtype=jnp.int32),
                     jnp.ones((M_pad, 1), jnp.float32),
                     params['sw13s'], params['sw2s'],
                     tm=tm_shared, tn=tn_s, out_dtype=x2.dtype)[:M]

    out = (y + z.astype(jnp.float32)).astype(x2.dtype)
    return out.reshape(orig_shape)


# ---------------------------------------------------------------------------
# Parameter init (PyTorch layout) and one-time kernel layout preparation
# ---------------------------------------------------------------------------
def _xavier_normal(key, out_f, in_f, dtype=jnp.float32):
    std = math.sqrt(2.0 / (in_f + out_f))
    return (std * jax.random.normal(key, (out_f, in_f), jnp.float32)).astype(dtype)


def init_moe_params(key, cfg, dtype=jnp.float32):
    E, dim = cfg['n_routed_experts'], cfg['dim']
    mi = cfg['moe_inter_dim']
    si = cfg['n_shared_experts'] * mi
    keys = jax.random.split(key, 3 * E + 4)
    gate_w = _xavier_normal(keys[0], E, dim, dtype)
    w1 = jnp.stack([_xavier_normal(keys[1 + 3 * e], mi, dim, dtype) for e in range(E)])
    w2 = jnp.stack([_xavier_normal(keys[2 + 3 * e], dim, mi, dtype) for e in range(E)])
    w3 = jnp.stack([_xavier_normal(keys[3 + 3 * e], mi, dim, dtype) for e in range(E)])
    sw1 = _xavier_normal(keys[3 * E + 1], si, dim, dtype)
    sw2 = _xavier_normal(keys[3 * E + 2], dim, si, dtype)
    sw3 = _xavier_normal(keys[3 * E + 3], si, dim, dtype)
    return dict(gate_w=gate_w, w1=w1, w2=w2, w3=w3, sw1=sw1, sw2=sw2, sw3=sw3)


def prepare_kernel_params(p, *, tn_routed=None, tn_shared=None):
    """One-time layout transform at weight-load time (no per-call transposes).

    W1 and W3 are fused into a single chunk-interleaved (E, dim, 2*inter)
    array so the kernel streams one weight chunk per inter step and does a
    single (tm,dim)x(dim,2*tn) MXU matmul.  The chosen tn values are stored
    in the params dict and consumed by moe_forward.
    TODO(synk): fp8 weight storage (+ per-chunk scales) for v7x not implemented.
    """
    w1t = jnp.swapaxes(p['w1'], 1, 2)    # (E, dim, inter)
    w3t = jnp.swapaxes(p['w3'], 1, 2)
    w2t = jnp.swapaxes(p['w2'], 1, 2)    # (E, inter, dim)
    sw1t = p['sw1'].T[None]              # (1, dim, shared_inter)
    sw3t = p['sw3'].T[None]
    sw2t = p['sw2'].T[None]              # (1, shared_inter, dim)

    inter = w1t.shape[-1]
    s_inter = sw1t.shape[-1]
    tn_r = _pick_tn(inter, tn_routed)
    tn_s = _pick_tn(s_inter, tn_shared)

    def fuse(a, b, tn):
        E, dim, it = a.shape
        nc = it // tn
        f = jnp.stack([a.reshape(E, dim, nc, tn),
                       b.reshape(E, dim, nc, tn)], axis=3)    # (E,dim,nc,2,tn)
        return f.reshape(E, dim, nc * 2 * tn)

    return dict(
        gate_w=p['gate_w'],
        w13s=fuse(w1t, w3t, tn_r), w2s=w2t,
        sw13s=fuse(sw1t, sw3t, tn_s), sw2s=sw2t,
        tn_r=tn_r, tn_s=tn_s,
    )


# ---------------------------------------------------------------------------
# Pure-JAX reference (matches the PyTorch MoE.forward semantics)
# ---------------------------------------------------------------------------
def _mlp_ref(x, w1, w2, w3):
    h1 = x @ w1.T
    h3 = x @ w3.T
    return ((h1 * jax.nn.sigmoid(h1)) * h3) @ w2.T


def moe_reference(x, p, cfg):
    dim, E, k = cfg['dim'], cfg['n_routed_experts'], cfg['n_activated_experts']
    x2 = x.reshape(-1, dim)
    scores = _gate_scores(x2, p['gate_w'])
    weights, indices = jax.lax.top_k(scores, k)
    weights = (weights * cfg.get('route_scale', 1.0)).astype(x2.dtype)
    y = jnp.zeros_like(x2)
    for e in range(E):
        w_e = jnp.where(indices == e, weights, 0.0).sum(axis=-1)
        y = y + _mlp_ref(x2, p['w1'][e], p['w2'][e], p['w3'][e]) * w_e[:, None]
    z = _mlp_ref(x2, p['sw1'], p['sw2'], p['sw3'])
    return (y + z).reshape(x.shape)


# ---------------------------------------------------------------------------
if __name__ == "__main__":
    # Small config consistent with the module (dim / moe_inter_dim / experts).
    cfg = dict(dim=64, moe_inter_dim=256, n_routed_experts=8,
               n_activated_experts=2, n_shared_experts=1, route_scale=1.0)
    batch, seq = 2, 8

    key = jax.random.PRNGKey(0)
    kp, kx = jax.random.split(key)
    params = init_moe_params(kp, cfg, dtype=jnp.float32)
    # tn=128 so the demo exercises >1 inter chunk (moe_inter_dim=256)
    kparams = prepare_kernel_params(params, tn_routed=128, tn_shared=128)

    x = jax.random.normal(kx, (batch, seq, cfg['dim']), dtype=jnp.float32)

    # small row blocks so the demo exercises multiple blocks + padding blocks
    out = moe_forward(x, kparams, cfg, tm_routed=8, tm_shared=8)
    out = jax.block_until_ready(out)

    ref = moe_reference(x, params, cfg)
    assert out.shape == x.shape
    max_diff = float(jnp.max(jnp.abs(out - ref)))
    assert jnp.allclose(out, ref, atol=1e-3, rtol=1e-3), \
        f"mismatch vs reference, max diff {max_diff}"

    print("KERNEL_OK")
</pallas_src>

<mosaic_0001>
module attributes {stable_mosaic.version = 11 : i64} {
  func.func @_grouped_mlp_kernel(%arg0: i32, %arg1: i32, %arg2: memref<12xi32, #tpu.memory_space<smem>>, %arg3: memref<12xi32, #tpu.memory_space<smem>>, %arg4: memref<8x64xf32, #tpu.memory_space<vmem>>, %arg5: memref<1x64x256xf32, #tpu.memory_space<vmem>>, %arg6: memref<1x128x64xf32, #tpu.memory_space<vmem>>, %arg7: memref<8x1xf32, #tpu.memory_space<vmem>>, %arg8: memref<8x64xf32, #tpu.memory_space<vmem>>, %arg9: memref<8x64xf32, #tpu.memory_space<vmem>>) attributes {dimension_semantics = [#tpu.dimension_semantics<parallel>, #tpu.dimension_semantics<arbitrary>], iteration_bounds = array<i64: 12, 2>, scalar_prefetch = 2 : i64, scratch_operands = 1 : i64, tpu.core_type = #tpu.core_type<tc>, window_params = [{transform_indices = @transform_0, window_bounds = array<i64: 8, 64>}, {transform_indices = @transform_1, window_bounds = array<i64: 1, 64, 256>}, {transform_indices = @transform_2, window_bounds = array<i64: 1, 128, 64>}, {transform_indices = @transform_3, window_bounds = array<i64: 8, 1>}, {transform_indices = @transform_4, window_bounds = array<i64: 8, 64>}]} {
    %0 = arith.index_cast %arg0 : i32 to index
    %1 = memref.load %arg3[%0] : memref<12xi32, #tpu.memory_space<smem>>
    %2 = arith.cmpi eq, %1, %arg0 : i32
    %c0_i32 = arith.constant 0 : i32
    %3 = arith.cmpi eq, %arg1, %c0_i32 : i32
    %4 = arith.andi %2, %3 : i1
    %5 = arith.extui %4 : i1 to i32
    %c0_i32_0 = arith.constant 0 : i32
    %6 = arith.cmpi ne, %5, %c0_i32_0 : i32
    scf.if %6 {
      %cst = arith.constant 0.000000e+00 : f32
      %13 = vector.broadcast %cst : f32 to vector<8x64xf32>
      %c0 = arith.constant 0 : index
      %c0_3 = arith.constant 0 : index
      %14 = vector.load %arg9[%c0, %c0_3] : memref<8x64xf32, #tpu.memory_space<vmem>>, vector<8x64xf32>
      tpu.vector_store %arg9[%c0, %c0_3], %13 {strides = array<i32>} : memref<8x64xf32, #tpu.memory_space<vmem>>, vector<8x64xf32>,
    } else {
    }
    %7 = arith.extui %2 : i1 to i32
    %c0_i32_1 = arith.constant 0 : i32
    %8 = arith.cmpi ne, %7, %c0_i32_1 : i32
    scf.if %8 {
      %c0 = arith.constant 0 : index
      %c0_3 = arith.constant 0 : index
      %13 = vector.load %arg4[%c0, %c0_3] : memref<8x64xf32, #tpu.memory_space<vmem>>, vector<8x64xf32>
      %c0_4 = arith.constant 0 : index
      %c0_5 = arith.constant 0 : index
      %c0_6 = arith.constant 0 : index
      %14 = vector.load %arg5[%c0_4, %c0_5, %c0_6] : memref<1x64x256xf32, #tpu.memory_space<vmem>>, vector<1x64x256xf32>
      %15 = vector.shape_cast %14 : vector<1x64x256xf32> to vector<64x256xf32>
      %cst = arith.constant dense<0.000000e+00> : vector<8x256xf32>
      %16 = tpu.matmul %13, %15, %cst {dimension_numbers = #tpu.dot_dimension_numbers<[1], [0], [0], [1], [0, 0, 1, 1], [], []>} : vector<8x64xf32>, vector<64x256xf32>, vector<8x256xf32> -> vector<8x256xf32>
      %17 = vector.extract_strided_slice %16 {offsets = [0, 0], sizes = [8, 128], strides = [1, 1]} : vector<8x256xf32> to vector<8x128xf32>
      %18 = vector.extract_strided_slice %16 {offsets = [0, 128], sizes = [8, 128], strides = [1, 1]} : vector<8x256xf32> to vector<8x128xf32>
      %19 = arith.negf %17 : vector<8x128xf32>
      %20 = math.exp %19 : vector<8x128xf32>
      %cst_7 = arith.constant 1.000000e+00 : f32
      %21 = vector.broadcast %cst_7 : f32 to vector<8x128xf32>
      %22 = arith.addf %21, %20 : vector<8x128xf32>
      %23 = arith.divf %21, %22 : vector<8x128xf32>
      %24 = arith.mulf %17, %23 : vector<8x128xf32>
      %25 = arith.mulf %24, %18 : vector<8x128xf32>
      %c0_8 = arith.constant 0 : index
      %c0_9 = arith.constant 0 : index
      %26 = vector.load %arg9[%c0_8, %c0_9] : memref<8x64xf32, #tpu.memory_space<vmem>>, vector<8x64xf32>
      %c0_10 = arith.constant 0 : index
      %c0_11 = arith.constant 0 : index
      %c0_12 = arith.constant 0 : index
      %27 = vector.load %arg6[%c0_10, %c0_11, %c0_12] : memref<1x128x64xf32, #tpu.memory_space<vmem>>, vector<1x128x64xf32>
      %28 = vector.shape_cast %27 : vector<1x128x64xf32> to vector<128x64xf32>
      %cst_13 = arith.constant dense<0.000000e+00> : vector<8x64xf32>
      %29 = tpu.matmul %25, %28, %cst_13 {dimension_numbers = #tpu.dot_dimension_numbers<[1], [0], [0], [1], [0, 0, 1, 1], [], []>} : vector<8x128xf32>, vector<128x64xf32>, vector<8x64xf32> -> vector<8x64xf32>
      %30 = arith.addf %26, %29 : vector<8x64xf32>
      %c0_14 = arith.constant 0 : index
      %c0_15 = arith.constant 0 : index
      %31 = vector.load %arg9[%c0_14, %c0_15] : memref<8x64xf32, #tpu.memory_space<vmem>>, vector<8x64xf32>
      tpu.vector_store %arg9[%c0_14, %c0_15], %30 {strides = array<i32>} : memref<8x64xf32, #tpu.memory_space<vmem>>, vector<8x64xf32>,
    } else {
    }
    %c1_i32 = arith.constant 1 : i32
    %9 = arith.cmpi eq, %arg1, %c1_i32 : i32
    %10 = arith.andi %2, %9 : i1
    %11 = arith.extui %10 : i1 to i32
    %c0_i32_2 = arith.constant 0 : i32
    %12 = arith.cmpi ne, %11, %c0_i32_2 : i32
    scf.if %12 {
      %c0 = arith.constant 0 : index
      %c0_3 = arith.constant 0 : index
      %13 = vector.load %arg9[%c0, %c0_3] : memref<8x64xf32, #tpu.memory_space<vmem>>, vector<8x64xf32>
      %c0_4 = arith.constant 0 : index
      %c0_5 = arith.constant 0 : index
      %14 = vector.load %arg7[%c0_4, %c0_5] : memref<8x1xf32, #tpu.memory_space<vmem>>, vector<8x1xf32>
      %15 = vector.broadcast %14 : vector<8x1xf32> to vector<8x64xf32>
      %16 = arith.mulf %13, %15 : vector<8x64xf32>
      %c0_6 = arith.constant 0 : index
      %c0_7 = arith.constant 0 : index
      %17 = vector.load %arg8[%c0_6, %c0_7] : memref<8x64xf32, #tpu.memory_space<vmem>>, vector<8x64xf32>
      tpu.vector_store %arg8[%c0_6, %c0_7], %16 {strides = array<i32>} : memref<8x64xf32, #tpu.memory_space<vmem>>, vector<8x64xf32>,
    } else {
    }
    return
  }
  func.func @transform_0(%arg0: i32, %arg1: i32, %arg2: memref<12xi32, #tpu.memory_space<smem>>, %arg3: memref<12xi32, #tpu.memory_space<smem>>) -> (i32, i32) {
    %0 = arith.index_cast %arg0 : i32 to index
    %1 = memref.load %arg3[%0] : memref<12xi32, #tpu.memory_space<smem>>
    %c0_i32 = arith.constant 0 : i32
    %c0_i32_0 = arith.constant 0 : i32
    return %1, %c0_i32 : i32, i32
  }
  func.func @transform_1(%arg0: i32, %arg1: i32, %arg2: memref<12xi32, #tpu.memory_space<smem>>, %arg3: memref<12xi32, #tpu.memory_space<smem>>) -> (i32, i32, i32) {
    %0 = arith.index_cast %arg0 : i32 to index
    %1 = memref.load %arg2[%0] : memref<12xi32, #tpu.memory_space<smem>>
    %2 = arith.index_cast %arg0 : i32 to index
    %3 = memref.load %arg3[%2] : memref<12xi32, #tpu.memory_space<smem>>
    %4 = arith.cmpi eq, %3, %arg0 : i32
    %c1_i32 = arith.constant 1 : i32
    %5 = arith.select %4, %arg1, %c1_i32 : i32
    %c0_i32 = arith.constant 0 : i32
    %c0_i32_0 = arith.constant 0 : i32
    return %1, %c0_i32, %5 : i32, i32, i32
  }
  func.func @transform_2(%arg0: i32, %arg1: i32, %arg2: memref<12xi32, #tpu.memory_space<smem>>, %arg3: memref<12xi32, #tpu.memory_space<smem>>) -> (i32, i32, i32) {
    %0 = arith.index_cast %arg0 : i32 to index
    %1 = memref.load %arg2[%0] : memref<12xi32, #tpu.memory_space<smem>>
    %2 = arith.index_cast %arg0 : i32 to index
    %3 = memref.load %arg3[%2] : memref<12xi32, #tpu.memory_space<smem>>
    %4 = arith.cmpi eq, %3, %arg0 : i32
    %c1_i32 = arith.constant 1 : i32
    %5 = arith.select %4, %arg1, %c1_i32 : i32
    %c0_i32 = arith.constant 0 : i32
    %c0_i32_0 = arith.constant 0 : i32
    return %1, %5, %c0_i32 : i32, i32, i32
  }
  func.func @transform_3(%arg0: i32, %arg1: i32, %arg2: memref<12xi32, #tpu.memory_space<smem>>, %arg3: memref<12xi32, #tpu.memory_space<smem>>) -> (i32, i32) {
    %0 = arith.index_cast %arg0 : i32 to index
    %1 = memref.load %arg3[%0] : memref<12xi32, #tpu.memory_space<smem>>
    %c0_i32 = arith.constant 0 : i32
    %c0_i32_0 = arith.constant 0 : i32
    return %1, %c0_i32 : i32, i32
  }
  func.func @transform_4(%arg0: i32, %arg1: i32, %arg2: memref<12xi32, #tpu.memory_space<smem>>, %arg3: memref<12xi32, #tpu.memory_space<smem>>) -> (i32, i32) {
    %c0_i32 = arith.constant 0 : i32
    %c0_i32_0 = arith.constant 0 : i32
    return %arg0, %c0_i32 : i32, i32
  }
}

</mosaic_0001>

<bundles_post_ra>
// kernel: tpu_custom_call.1
= control target key start
LH: loop header
LB: loop body
LE: loop exit
PB: predicated region body
PF: predicated region fallthrough
CT: control target
= control target key end

     0   :  { %s1256_s0 = inlined_call_operand.vmem [shape: s32[12], index: 0, kind: input, shape index: {}]   ;;  %s1257_s2 = inlined_call_operand.vmem [shape: f32[96,64], index: 2, kind: input, shape index: {}]   ;;  %s1258_s3 = inlined_call_operand.vmem [shape: f32[8,64,512], index: 3, kind: input, shape index: {}]   ;;  %s1259_s4 = inlined_call_operand.vmem [shape: f32[8,256,64], index: 4, kind: input, shape index: {}]   ;;  %s1260_s5 = inlined_call_operand.vmem [shape: f32[96,1], index: 5, kind: input, shape index: {}]   ;;  %s1261_s6 = inlined_call_operand.vmem [shape: f32[96,64], index: 6, kind: output, shape index: {}]   ;;  %s1262_s1 = inlined_call_operand.vmem [shape: s32[12], index: 1, kind: input, shape index: {}]  }
   0x1   :  { %1263 = sst [smem:[#allocation8_spill]] %s1257_s2  ;;  %s11_s23 = sshll.u32 %s1256_s0, 4  ;;  %s12_s23 = int_to_ptr.vmem [resolvable:$true] %s11_s23 }
   0x2   :  { %s15_s26 = sshll.u32 %s1262_s1, 4  ;;  %s915_s27 = scalar_lea.vmem %s12_s23, 16  ;;  %s16_s26 = int_to_ptr.vmem [resolvable:$true] %s15_s26 }
   0x3   :  { %p916_p0 = scmp.ne.s32.totalorder %s12_s23, %s915_s27  ;;  %p920_p1 = scmp.lt.s32.totalorder %s12_s23, %s12_s23 }
   0x4   :  { %p921_p2 = scmp.lt.s32.totalorder %s915_s27, %s915_s27 }
   0x6   :  { %p922_p3 = por %p921_p2, %p920_p1 }
   0x8   :  { %p923_p4 = pnand %p922_p3, %p916_p0 }
   0xa   :  { %926 = shalt.err (!%p923_p4)  }
   0xb   :  { %s997_s28 = smov [#allocation4]   ;;  %s927_s29 = scalar_lea.vmem %s16_s26, 16 }
   0xc   :  { %14 = dma.vmem_to_smem %s12_s23, 16, %s997_s28, [#allocation3] }
   0xd   :  { %p928_p5 = scmp.ne.s32.totalorder %s16_s26, %s927_s29  ;;  %p932_p6 = scmp.lt.s32.totalorder %s16_s26, %s16_s26 }
   0xe   :  { %p933_p7 = scmp.lt.s32.totalorder %s927_s29, %s927_s29 }
  0x10   :  { %p934_p8 = por %p933_p7, %p932_p6 }
  0x12   :  { %p935_p9 = pnand %p934_p8, %p928_p5 }
  0x14   :  { %938 = shalt.err (!%p935_p9)  }
  0x15   :  { %s998_s0 = smov [#allocation5]  }
  0x16   :  { %18 = dma.vmem_to_smem %s16_s26, 16, %s998_s0, [#allocation3] }
  0x17   :  { %967 = dma.done.wait [#allocation3], 32 }
  0x18   :  { %968 = vsyncadd [#allocation3], 4294967264 }
  0x19   :  { %20 = sfence }
  0x1a   :  { %s1045_s1 = smov 0   ;;  %s1047_s30 = smov 0  }
  0x1b   :  { %s1049_s7 = smov 0   ;;  %s1051_s8 = smov 0  }
  0x1c   :  { %s1053_s9 = smov 0   ;;  %s1055_s10 = smov 0  }
  0x1d   :  { %s1057_s11 = smov 0  }
  0x1e LB: > { %s35_s12 = sadd.s32 1, %s987_s9  ;;  %s38_s13 = sadd.s32 1, %s991_s10  ;;  %s995_s11 = sphi %s1057_s11, %s26_s11   ;;  %s991_s10 = sphi %s1055_s10, %s1271_s10   ;;  %s987_s9 = sphi %s1053_s9, %s1270_s9   ;;  %s983_s8 = sphi %s1051_s8, %s1269_s8   ;;  %s979_s7 = sphi %s1049_s7, %s1268_s7   ;;  %s975_s30 = sphi %s1047_s30, %s1267_s30   ;;  %s971_s1 = sphi %s1045_s1, %s1266_s1  }
  0x1f   : > { %p36_p10 = scmp.ge.s32.totalorder %s35_s12, 2  ;;  %s71_s14 = sld [smem:[#allocation5 + %s991_s10]] }
  0x20   : > { %p90_p11 = scmp.ne.s32.totalorder %s975_s30, %s971_s1  ;;  %p91_p12 = scmp.eq.s32.totalorder %s995_s11, 0 }
  0x21   : > { %s1273_s13 = smov (!%p36_p10, %s38_s13), %s991_s10  ;;  %s70_s16 = sld [smem:[#allocation4 + %s991_s10]] }
  0x22   : > { %p40_p13 = scmp.ge.s32.totalorder %s1273_s13, 12  ;;  %p1087_p0 = por %p91_p12, %p90_p11 }
  0x23   : > { %s1277_s12 = smov (%p36_p10, %s35_s12), 0  ;;  %s83_s24 = sadd.s32 1, %s975_s30 }
  0x24   : > { %s1275_s13 = smov (%p40_p13, %s1273_s13), 0  ;;  %p737_p4 = scmp.ge.s32.totalorder %s995_s11, 24 }
  0x25   : > { %s74_s17 = sld [smem:[#allocation4 + %s1275_s13]]  ;;  %p72_p1 = scmp.eq.s32.totalorder %s71_s14, %s991_s10 }
  0x26   : > { %s75_s18 = sld [smem:[#allocation5 + %s1275_s13]] }
  0x27   : > { %s73_s19 = scalar_select %p72_p1, %s987_s9, 1 }
  0x2b   : > { %s78_s20 = ssub.s32 %s70_s16, %s74_s17 }
  0x2c   : > { %p76_p2 = scmp.eq.s32.totalorder %s75_s18, %s1275_s13 }
  0x2e   : > { %s77_s21 = scalar_select %p76_p2, %s1277_s12, 1 }
  0x2f   : > { %206 = sbr.rel (%p737_p4) target bundleno = 78 (0x4e), region = 16 }
  0x30   : > { %s79_s22 = ssub.s32 %s73_s19, %s77_s21 }
  0x31   : > { %s80_s23 = sor.u32 %s79_s22, %s78_s20 }
  0x32   : > { %p81_p3 = scmp.eq.s32.totalorder %s80_s23, 0 }
  0x34   : > { %s1104_s25 = scalar_select %p81_p3, %s975_s30, %s83_s24  }
  0x36   : > { %218 = sbr.rel (!%p1087_p0) target bundleno = 78 (0x4e), region = 24  ;;  %s223_s26 = sld [smem:[#allocation4 + %s991_s10]] (%p1087_p0) }
  0x37   : > { %s224_s27 = sld [smem:[#allocation5 + %s991_s10]] (%p1087_p0)  ;;  %s220_s28 = sand.u32 (%p1087_p0), 1, %s975_s30  }
  0x38   : > { %s738_s14 = sshll.u32 (%p1087_p0), %s220_s28, 7 }
  0x39   : > { %s222_s21 = scalar_lea.vmem (%p1087_p0), [#allocation6], %s738_s14 }
  0x3c   : > { %s740_s29 = sshll.u32 (%p1087_p0), %s223_s26, 5 }
  0x3d   : > { %p225_p5 = scmp.eq.s32.totalorder %s224_s27, %s991_s10 }
  0x3f   : > { %s226_s0 = scalar_select %p225_p5, %s987_s9, 1 }
  0x41   : > { %s739_s16 = sshll.u32 %s226_s0, 1 }
  0x42   : > { %s229_s17 = sadd.s32 %s740_s29, %s739_s16 }
  0x43   : > { %s741_s18 = sshll.u32 %s229_s17, 3 }
  0x44   : > { %s1117_s15 = scalar_lea.vmem %s1258_s3, %s741_s18 }
  0x45   : > { %v244_v0 = vld [vmem:[%s1117_s15] sm:$0xff]  ;;  %v246_v1 = vld [vmem:[%s1117_s15 + $0x8] sm:$0xff] }
  0x46   : > { %v248_v2 = vld [vmem:[%s1117_s15 + $0x20] sm:$0xff]  ;;  %245 = vst [vmem:[%s222_s21] sm:$0xff] %v244_v0  ;;  %247 = vst [vmem:[%s222_s21 + $0x8] sm:$0xff] %v246_v1  ;;  %v250_v3 = vld [vmem:[%s1117_s15 + $0x28] sm:$0xff] }
  0x47   : > { %249 = vst [vmem:[%s222_s21 + $0x10] sm:$0xff] %v248_v2  ;;  %v252_v4 = vld [vmem:[%s1117_s15 + $0x40] sm:$0xff]  ;;  %v254_v5 = vld [vmem:[%s1117_s15 + $0x48] sm:$0xff]  ;;  %251 = vst [vmem:[%s222_s21 + $0x18] sm:$0xff] %v250_v3 }
  0x48   : > { %253 = vst [vmem:[%s222_s21 + $0x20] sm:$0xff] %v252_v4  ;;  %255 = vst [vmem:[%s222_s21 + $0x28] sm:$0xff] %v254_v5  ;;  %v256_v6 = vld [vmem:[%s1117_s15 + $0x60] sm:$0xff]  ;;  %v258_v7 = vld [vmem:[%s1117_s15 + $0x68] sm:$0xff] }
  0x49   : > { %v260_v8 = vld [vmem:[%s1117_s15 + $0x80] sm:$0xff]  ;;  %257 = vst [vmem:[%s222_s21 + $0x30] sm:$0xff] %v256_v6  ;;  %259 = vst [vmem:[%s222_s21 + $0x38] sm:$0xff] %v258_v7  ;;  %v262_v9 = vld [vmem:[%s1117_s15 + $0x88] sm:$0xff] }
  0x4a   : > { %261 = vst [vmem:[%s222_s21 + $0x40] sm:$0xff] %v260_v8  ;;  %v264_v10 = vld [vmem:[%s1117_s15 + $0xa0] sm:$0xff]  ;;  %v266_v11 = vld [vmem:[%s1117_s15 + $0xa8] sm:$0xff]  ;;  %263 = vst [vmem:[%s222_s21 + $0x48] sm:$0xff] %v262_v9 }
  0x4b   : > { %265 = vst [vmem:[%s222_s21 + $0x50] sm:$0xff] %v264_v10  ;;  %267 = vst [vmem:[%s222_s21 + $0x58] sm:$0xff] %v266_v11  ;;  %v268_v12 = vld [vmem:[%s1117_s15 + $0xc0] sm:$0xff]  ;;  %v270_v13 = vld [vmem:[%s1117_s15 + $0xc8] sm:$0xff] }
  0x4c   : > { %v272_v14 = vld [vmem:[%s1117_s15 + $0xe0] sm:$0xff]  ;;  %269 = vst [vmem:[%s222_s21 + $0x60] sm:$0xff] %v268_v12  ;;  %271 = vst [vmem:[%s222_s21 + $0x68] sm:$0xff] %v270_v13  ;;  %v274_v15 = vld [vmem:[%s1117_s15 + $0xe8] sm:$0xff] }
  0x4d   : > { %273 = vst [vmem:[%s222_s21 + $0x70] sm:$0xff] %v272_v14  ;;  %275 = vst [vmem:[%s222_s21 + $0x78] sm:$0xff] %v274_v15 }
  0x4e PF: > { %p742_p6 = scmp.ge.s32.totalorder %s995_s11, 1  ;;  %p310_p7 = scmp.lt.s32.totalorder %s995_s11, 25 }
  0x50   : > { %p311_p8 = pnand %p742_p6, %p310_p7 }
  0x51   : > { %s317_s22 = sand.u32 (!%p311_p8), 1, %s971_s1   ;;  %s364_s23 = sld [smem:[#allocation5 + %s983_s8]] (!%p311_p8) }
  0x52   : > { %314 = sbr.rel (%p311_p8) target bundleno = 720 (0x2d0), region = 55  ;;  %s1139_s24 = sshll.u32 (!%p311_p8), %s317_s22, 7 }
  0x53   : > { %s375_s26 = sld [smem:[#allocation4 + %s983_s8]] (!%p311_p8)  ;;  %p399_p9 = scmp.lt.s32.totalorder (!%p311_p8), %s983_s8, 11 }
  0x54   : > { %s376_s27 = sld [smem:[#allocation5 + %s983_s8]] (!%p311_p8)  ;;  %p405_p11 = scmp.eq.s32.totalorder (!%p311_p8), %s979_s7, 0 }
  0x55   : > { %s393_s28 = sld [smem:[#allocation5 + %s983_s8]] (!%p311_p8) }
  0x56   : > { %s1146_s29 = sld [smem:[#allocation5 + %s983_s8]] (!%p311_p8) }
  0x57   : > { %p365_p10 = scmp.lt.s32.totalorder (!%p311_p8), %s364_s23, 11  ;;  %s1265_s2 = sld [smem:[#allocation8_spill]] (!%p311_p8) }
  0x59   : > { %s400_s0 = scalar_select %p399_p9, %s983_s8, 11 }
  0x5a   : > { %p380_p12 = scmp.lt.s32.totalorder %s375_s26, 7  ;;  %s1279_s23 = smov (!%p365_p10, %s364_s23), 11 }
  0x5b   : > { %s749_s1 = sshll.u32 %s400_s0, 3  ;;  %p377_p13 = scmp.eq.s32.totalorder %s376_s27, %s983_s8 }
  0x5c   : > { %p394_p0 = scmp.lt.s32.totalorder %s393_s28, 11  ;;  %s744_s14 = sshll.u32 %s1279_s23, 3 }
  0x5d   : > { %s1154_s18 = scalar_lea.vmem %s1261_s6, %s749_s1  ;;  %s1159_s15 = scalar_lea.vmem %s1265_s2, %s744_s14 }
  0x5e   : > { %p404_p1 = scmp.eq.s32.totalorder %s1146_s29, %s983_s8  ;;  %s1281_s26 = smov (!%p380_p12, %s375_s26), 7 }
  0x5f   : > { %s378_s21 = scalar_select %p377_p13, %s979_s7, 1 }
  0x60   : > { %p406_p2 = pnand %p405_p11, %p404_p1  ;;  %s746_s23 = sshll.u32 %s1281_s26, 5 }
  0x61   : > { %s745_s22 = sshll.u32 %s378_s21, 4  ;;  %s1283_s28 = smov (!%p394_p0, %s393_s28), 11  ;;  %vm410_vm0 = vcmask (!%p406_p2), 523264   ;;  %v999_v16 = vmov (!%p406_p2), 0.0  }
  0x62   : > { %p382_p3 = scmp.lt.s32.totalorder %s745_s22, 31  ;;  %s748_s27 = sshll.u32 %s1283_s28, 3  ;;  %411 = vst.msk [vmem:[#allocation2] sm:$0xff] (!%p406_p2), %vm410_vm0, %v999_v16 }
  0x63   : > { %s1172_s17 = scalar_lea.vmem %s1260_s5, %s748_s27  ;;  %s1180_s21 = scalar_lea.vmem [#allocation6], %s1139_s24 }
  0x64   : > { %s1285_s22 = smov (!%p382_p3, %s745_s22), 31  ;;  %409 = sbr.rel (%p406_p2) target bundleno = 107 (0x6b), region = 63 }
  0x65   : > { %s385_s0 = sadd.s32 %s746_s23, %s1285_s22 }
  0x66   : > { %s747_s14 = sshll.u32 %s385_s0, 3 }
  0x67   : > { %s1177_s2 = scalar_lea.vmem %s1259_s4, %s747_s14 }
  0x6b PF: > { %p750_p4 = scmp.ne.s32.totalorder %s1146_s29, %s983_s8 }
  0x6c   : > { %v417_v17 = vld [vmem:[%s1180_s21 + $0x8] sm:$0xff] (!%p750_p4)  ;;  %v419_v18 = vld [vmem:[%s1180_s21 + $0x18] sm:$0xff] (!%p750_p4)  ;;  %v416_v19 = vld [vmem:[%s1180_s21] sm:$0xff] (!%p750_p4)  ;;  %v1000_v24 = vmov (!%p750_p4), 0.0   ;;  %v1001_v25 = vmov (!%p750_p4), 0.0|0.0   ;;  %vm432_vm1 = vcmask (!%p750_p4), 523264  }
  0x6d   : > { %414 = sbr.rel (%p750_p4) target bundleno = 584 (0x248), region = 67  ;;  %v807_v20 = vpack.c.bf16 (!%p750_p4), %v419_v18, %v417_v17  ;;  %v418_v21 = vld [vmem:[%s1180_s21 + $0x10] sm:$0xff] (!%p750_p4)  ;;  %v421_v22 = vld [vmem:[%s1180_s21 + $0x28] sm:$0xff] (!%p750_p4)  ;;  %v423_v23 = vld [vmem:[%s1180_s21 + $0x38] sm:$0xff] (!%p750_p4)  ;;  %500 = vmatprep.mubr.f32.mxu0 (!%p750_p4), %v1000_v24  ;;  %823 = vmatprep.subr.bf16.mxu1 (!%p750_p4), %v1001_v25  ;;  %vm1002_vm2 = vmmov (!%p750_p4), 0  }
  0x6e   : > { %v809_v26 = vpack.c.bf16 (!%p750_p4), %v418_v21, %v416_v19  ;;  %v811_v27 = vpack.c.bf16 (!%p750_p4), %v423_v23, %v421_v22  ;;  %v420_v28 = vld [vmem:[%s1180_s21 + $0x20] sm:$0xff] (!%p750_p4)  ;;  %v422_v29 = vld [vmem:[%s1180_s21 + $0x30] sm:$0xff] (!%p750_p4)  ;;  %v425_v30 = vld [vmem:[%s1180_s21 + $0x48] sm:$0xff] (!%p750_p4)  ;;  %804 = vmatprep.mubr.msk.f32.mxu1 (!%p750_p4), %vm1002_vm2, %v1000_v24 }
  0x6f   : > { %808 = vmatprep.subr.bf16.mxu0 (!%p750_p4), %v807_v20  ;;  %v427_v31 = vld [vmem:[%s1180_s21 + $0x58] sm:$0xff] (!%p750_p4)  ;;  %v813_v32 = vpack.c.bf16 (!%p750_p4), %v422_v29, %v420_v28  ;;  %v424_v34 = vld [vmem:[%s1180_s21 + $0x40] sm:$0xff] (!%p750_p4)  ;;  %v426_v35 = vld [vmem:[%s1180_s21 + $0x50] sm:$0xff] (!%p750_p4) }
  0x70   : > { %810 = vmatpush1.bf16.msra.mxu0 (!%p750_p4), %v809_v26  ;;  %v815_v33 = vpack.c.bf16 (!%p750_p4), %v427_v31, %v425_v30  ;;  %v429_v36 = vld [vmem:[%s1180_s21 + $0x68] sm:$0xff] (!%p750_p4)  ;;  %v431_v37 = vld [vmem:[%s1180_s21 + $0x78] sm:$0xff] (!%p750_p4)  ;;  %v817_v38 = vpack.c.bf16 (!%p750_p4), %v426_v35, %v424_v34  ;;  %v428_v40 = vld [vmem:[%s1180_s21 + $0x60] sm:$0xff] (!%p750_p4) }
  0x71   : > { %812 = vmatprep.subr.bf16.mxu0 (!%p750_p4), %v811_v27  ;;  %v819_v39 = vpack.c.bf16 (!%p750_p4), %v431_v37, %v429_v36  ;;  %v430_v41 = vld [vmem:[%s1180_s21 + $0x70] sm:$0xff] (!%p750_p4)  ;;  %v415_v43 = vld [vmem:[%s1159_s15] sm:$0xff] (!%p750_p4)  ;;  %v517_v45 = vld [vmem:[%s1177_s2 + $0x8] sm:$0xff] (!%p750_p4) }
  0x72   : > { %v821_v42 = vpack.c.bf16 (!%p750_p4), %v430_v41, %v428_v40  ;;  %v516_v44 = vld [vmem:[%s1177_s2] sm:$0xff] (!%p750_p4)  ;;  %v518_v47 = vld [vmem:[%s1177_s2 + $0x10] sm:$0xff] (!%p750_p4)  ;;  %v519_v48 = vld [vmem:[%s1177_s2 + $0x18] sm:$0xff] (!%p750_p4) }
  0x73   : > { %v824_v46 = vpack.c.bf16 (!%p750_p4), %v517_v45, %v516_v44  ;;  %v827_v49 = vpack.c.bf16 (!%p750_p4), %v519_v48, %v518_v47  ;;  %v520_v50 = vld [vmem:[%s1177_s2 + $0x20] sm:$0xff] (!%p750_p4)  ;;  %v521_v51 = vld [vmem:[%s1177_s2 + $0x28] sm:$0xff] (!%p750_p4)  ;;  %v522_v53 = vld [vmem:[%s1177_s2 + $0x30] sm:$0xff] (!%p750_p4) }
  0x74   : > { %814 = vmatpush1.bf16.msra.mxu0 %v813_v32  ;;  %v830_v52 = vpack.c.bf16 %v521_v51, %v520_v50  ;;  %v523_v54 = vld [vmem:[%s1177_s2 + $0x38] sm:$0xff]  ;;  %v524_v56 = vld [vmem:[%s1177_s2 + $0x40] sm:$0xff]  ;;  %v525_v57 = vld [vmem:[%s1177_s2 + $0x48] sm:$0xff] }
  0x75   : > { %816 = vmatprep.subr.bf16.mxu0 %v815_v33  ;;  %825 = vmatpush3.bf16.msra.mxu1 %v824_v46  ;;  %v833_v55 = vpack.c.bf16 %v523_v54, %v522_v53  ;;  %v836_v58 = vpack.c.bf16 %v525_v57, %v524_v56  ;;  %v526_v59 = vld [vmem:[%s1177_s2 + $0x50] sm:$0xff]  ;;  %v527_v60 = vld [vmem:[%s1177_s2 + $0x58] sm:$0xff]  ;;  %v528_v62 = vld [vmem:[%s1177_s2 + $0x60] sm:$0xff] }
  0x76   : > { %826 = vmatprep.subr.bf16.mxu1 %v1001_v25  ;;  %v839_v61 = vpack.c.bf16 %v527_v60, %v526_v59  ;;  %v529_v63 = vld [vmem:[%s1177_s2 + $0x68] sm:$0xff]  ;;  %v530_v1 = vld [vmem:[%s1177_s2 + $0x70] sm:$0xff]  ;;  %v531_v2 = vld [vmem:[%s1177_s2 + $0x78] sm:$0xff] }
  0x77   : > { %v842_v0 = vpack.c.bf16 %v529_v63, %v528_v62  ;;  %v845_v3 = vpack.c.bf16 %v531_v2, %v530_v1  ;;  %v515_v12 = vld [vmem:[#allocation2] sm:$0xff] }
  0x78   : > { %818 = vmatpush1.bf16.msra.mxu0 %v817_v38 }
  0x79   : > { %820 = vmatprep.subr.bf16.mxu0 %v819_v39  ;;  %828 = vmatpush3.bf16.msra.mxu1 %v827_v49 }
  0x7a   : > { %829 = vmatprep.subr.bf16.mxu1 %v1001_v25 }
  0x7c   : > { %822 = vmatpush1.bf16.msra.mxu0 %v821_v42 }
  0x7d   : > { %831 = vmatpush3.bf16.msra.mxu1 %v830_v52 }
  0x7e   : > { %832 = vmatprep.subr.bf16.mxu1 %v1001_v25 }
  0x7f   : > { %751 = vmatmul.mubr.msk.f32.vlgmr.msra.gmra.mrb[0].mxu0 %vm432_vm1, %v415_v43 }
  0x81   : > { %834 = vmatpush3.bf16.msra.mxu1 %v833_v55 }
  0x82   : > { %835 = vmatprep.subr.bf16.mxu1 %v1001_v25 }
  0x85   : > { %837 = vmatpush3.bf16.msra.mxu1 %v836_v58 }
  0x86   : > { %838 = vmatprep.subr.bf16.mxu1 %v1001_v25 }
  0x89   : > { %840 = vmatpush3.bf16.msra.mxu1 %v839_v61 }
  0x8a   : > { %841 = vmatprep.subr.bf16.mxu1 %v1001_v25 }
  0x8d   : > { %843 = vmatpush3.bf16.msra.mxu1 %v842_v0 }
  0x8e   : > { %844 = vmatprep.subr.bf16.mxu1 %v1001_v25 }
  0x91   : > { %846 = vmatpush3.bf16.msra.mxu1 %v845_v3 }
 0x152   : > { %v502_v4 = vpop.f32.mrb[0].mxu0 }
 0x153   : > { %v752_v5 = vmul.f32 -1.442695, %v502_v4  ;;  %v504_v6 = vpop.f32.mrb[1].mxu0 }
 0x155   : > { %910 = vpow2.f32 %v752_v5 }
 0x15f   : > { %v911_v7 = vpop.eup %910 }
 0x160   : > { %v510_v8 = vadd.f32 1.0, %v911_v7 }
 0x162   : > { %912 = vrcp.f32 %v510_v8 }
 0x16c   : > { %v913_v9 = vpop.eup %912 }
 0x16d   : > { %v513_v10 = vmul.f32 %v913_v9, %v502_v4 }
 0x16f   : > { %v514_v11 = vmul.f32 %v513_v10, %v504_v6 }
 0x171   : > { %805 = vmatmul.mubr.f32.vlgmr.msra.gmra.mrb[0].mxu1 %v514_v11 }
 0x244   : > { %v598_v13 = vpop.f32.mrb[0].mxu1 }
 0x245   : > { %v602_v14 = vadd.f32 %v598_v13, %v515_v12  ;;  %v806_v15 = vpop.f32.mrb[1].mxu1 }
 0x247   : > { %603 = vst.msk [vmem:[#allocation2] sm:$0xff] %vm432_vm1, %v602_v14 }
 0x248 PF: > { %p604_p5 = scmp.eq.s32.totalorder %s979_s7, 1 }
 0x24a   : > { %p605_p6 = pnand %p604_p5, %p404_p1 }
 0x24b   : > { %v610_v16 = vld [vmem:[%s1172_s17] sm:$0xff] (!%p605_p6)  ;;  %v1003_v17 = vmov (!%p605_p6), 0   ;;  %vm617_vm3 = vcmask (!%p605_p6), 523264  }
 0x24c   : > { %608 = sbr.rel (%p605_p6) target bundleno = 720 (0x2d0), region = 71  ;;  %914 = vset.pattern.permute.xlu0 (!%p605_p6), %v1003_v17 }
 0x24d   : > { %613 = vperm.xlu0 (!%p605_p6), %914, %v610_v16  }
 0x24e   : > { %v609_v18 = vld [vmem:[#allocation2] sm:$0xff] (!%p605_p6) }
 0x2cc   : > { %v614_v19 = vpop.permute.xlu0 %613 }
 0x2cd   : > { %v616_v20 = vmul.f32 %v614_v19, %v609_v18 }
 0x2cf   : > { %618 = vst.msk [vmem:[%s1154_s18] sm:$0xff] %vm617_vm3, %v616_v20 }
 0x2d0 PF: > { %s26_s11 = sadd.s32 1, %s995_s11   ;;  %s1266_s1 = smov %s975_s30 }
 0x2d1   : > { %p23_p7 = scmp.ge.s32.totalorder %s26_s11, 26   ;;  %s1267_s30 = smov %s1104_s25 }
 0x2d2   : > { %s1268_s7 = smov %s987_s9  ;;  %s1269_s8 = smov %s991_s10 }
 0x2d3   : > { %s1270_s9 = smov %s1277_s12  ;;  %s1271_s10 = smov %s1275_s13 }
 0x2d4   :  { %25 = sbr.rel (!%p23_p7) target bundleno = 30 (0x1e), region = 115 }

</bundles_post_ra>
